<compile_context>
chip_gen: v6e
topology: v6e:2x2x1
jax: 0.10.0
libtpu: 0.0.40
codegen_flags: <defaults>
</compile_context>

<pallas_src>
import functools

import jax
import jax.numpy as jnp
from jax import lax
from jax.experimental import pallas as pl
from jax.experimental.pallas import tpu as pltpu


def _tcnn_kernel(*refs, kernel_size, dilation, l_tile, halo,
                 has_halo, has_res_conv):
    i = 0
    x_ref = refs[i]; i += 1
    if has_halo:
        h_ref = refs[i]; i += 1
    else:
        h_ref = None
    w1_ref, b1_ref, w2_ref, b2_ref = refs[i:i + 4]; i += 4
    if has_res_conv:
        wr_ref, br_ref = refs[i:i + 2]; i += 2
    else:
        wr_ref = br_ref = None
    o_ref = refs[i]

    f32 = jnp.float32
    K = kernel_size
    P = (K - 1) * dilation
    W = l_tile
    t = pl.program_id(1)

    x_tile = x_ref[0]                                    # (Cin, W), matmul dtype

    if has_halo:
        # Halo concat at a 128-aligned lane offset: no rotate of the main tile.
        xpad = jnp.concatenate([h_ref[0, 0], x_tile], axis=1)   # (Cin, HALO+W)
        start1, out1 = halo - 2 * P, P + W
    else:
        xpad = x_tile
        start1, out1 = 0, W

    def conv(inp, w_ref, b_ref, start, out_w):
        # K small MXU matmuls accumulated in f32 (avoids im2col relayout).
        acc = None
        for k in range(K):
            s = start + k * dilation
            part = jnp.dot(w_ref[k], inp[:, s:s + out_w],
                           preferred_element_type=f32)
            acc = part if acc is None else acc + part
        return acc + b_ref[...]                          # bias (Cout, 1), f32

    # conv1 + chomp + ReLU; P extra leading columns recomputed as the causal
    # halo that conv2's receptive field needs.
    h1 = jnp.maximum(conv(xpad, w1_ref, b1_ref, start1, out1), 0.0)

    if P > 0:
        # h1 columns whose absolute sequence position is < 0 are conv2's
        # causal ZERO padding, not relu(conv1(0) + b1).
        col = lax.broadcasted_iota(jnp.int32, h1.shape, 1)
        h1 = jnp.where(col < (P - t * W), 0.0, h1)

    # conv2 + chomp + ReLU.
    h2 = jnp.maximum(conv(h1.astype(w2_ref.dtype), w2_ref, b2_ref, 0, W), 0.0)

    # Residual branch (1x1 conv iff Cin != Cout); dropout == identity (eval).
    if has_res_conv:
        res = jnp.dot(wr_ref[...], x_tile, preferred_element_type=f32) + br_ref[...]
    else:
        res = x_tile.astype(f32)

    o_ref[0] = jnp.maximum(h2 + res, 0.0).astype(o_ref.dtype)


def tcnn_block(x_ncw, params, *, kernel_size=3, dilation=1, l_tile=512,
               use_bf16_matmul=False):
    """x_ncw: (B, Cin, L) float32 (PyTorch NCW). Returns (B, Cout, L).

    params = (w1, b1, w2, b2, wr, br) in PyTorch layouts:
      w1: (Cout, Cin, K), w2: (Cout, Cout, K), wr: (Cout, Cin, 1) or None.
    """
    w1, b1, w2, b2, wr, br = params
    B, Cin, L = x_ncw.shape
    Cout = w1.shape[0]
    K = kernel_size
    P = (K - 1) * dilation
    has_res_conv = wr is not None
    has_halo = P > 0
    if not has_res_conv and Cin != Cout:
        raise ValueError("residual 1x1 conv required when in_channels != out_channels")
    if l_tile % 128 != 0:
        raise ValueError("l_tile must be a multiple of 128 (lane-dense blocks)")

    num_tiles = pl.cdiv(L, l_tile)
    Lp = num_tiles * l_tile
    x_p = jnp.pad(x_ncw, ((0, 0), (0, 0), (0, Lp - L))) if Lp != L else x_ncw

    mm_dtype = jnp.bfloat16 if use_bf16_matmul else x_ncw.dtype
    f32 = jnp.float32

    # Per-tap weight slices (K, Cout, Cin): each tap is one small matmul.
    # Pre-cast once here (loop-invariant) rather than per tile in the kernel.
    w1k = jnp.transpose(w1, (2, 0, 1)).astype(mm_dtype)      # (K, Cout, Cin)
    w2k = jnp.transpose(w2, (2, 0, 1)).astype(mm_dtype)      # (K, Cout, Cout)
    b1c = b1.reshape(Cout, 1).astype(f32)
    b2c = b2.reshape(Cout, 1).astype(f32)

    args = [x_p.astype(mm_dtype)]
    in_specs = [pl.BlockSpec((1, Cin, l_tile), lambda b, t: (b, 0, t))]

    HALO = 0
    if has_halo:
        # 128-aligned causal x-halo per tile: the last HALO (>= 2P) columns
        # preceding each tile, zeros where positions are negative.  Built once
        # in HBM; removes the cross-tile carry (and its serialization).
        HALO = 128 * pl.cdiv(2 * P, 128)
        xl = jnp.pad(x_p, ((0, 0), (0, 0), (HALO, 0)))
        x_halo = jnp.stack(
            [xl[:, :, ti * l_tile: ti * l_tile + HALO] for ti in range(num_tiles)],
            axis=1).astype(mm_dtype)                         # (B, T, Cin, HALO)
        args.append(x_halo)
        in_specs.append(pl.BlockSpec((1, 1, Cin, HALO), lambda b, t: (b, t, 0, 0)))

    args += [w1k, b1c, w2k, b2c]
    in_specs += [
        pl.BlockSpec((K, Cout, Cin), lambda b, t: (0, 0, 0)),
        pl.BlockSpec((Cout, 1), lambda b, t: (0, 0)),
        pl.BlockSpec((K, Cout, Cout), lambda b, t: (0, 0, 0)),
        pl.BlockSpec((Cout, 1), lambda b, t: (0, 0)),
    ]
    if has_res_conv:   # only pass residual weights when they exist
        args += [wr.reshape(Cout, Cin).astype(mm_dtype),
                 br.reshape(Cout, 1).astype(f32)]
        in_specs += [pl.BlockSpec((Cout, Cin), lambda b, t: (0, 0)),
                     pl.BlockSpec((Cout, 1), lambda b, t: (0, 0))]

    kern = functools.partial(
        _tcnn_kernel, kernel_size=K, dilation=dilation, l_tile=l_tile,
        halo=HALO, has_halo=has_halo, has_res_conv=has_res_conv)

    in_bytes = int(jnp.dtype(mm_dtype).itemsize)
    out_bytes = int(jnp.dtype(x_ncw.dtype).itemsize)
    flops = 2 * B * Lp * (Cout * K * Cin + Cout * K * Cout
                          + (Cout * Cin if has_res_conv else 0))
    bytes_accessed = (B * Lp * Cin * in_bytes
                      + B * num_tiles * Cin * HALO * in_bytes
                      + B * Lp * Cout * out_bytes)

    out = pl.pallas_call(
        kern,
        out_shape=jax.ShapeDtypeStruct((B, Cout, Lp), x_ncw.dtype),
        grid_spec=pltpu.PrefetchScalarGridSpec(
            num_scalar_prefetch=0,
            grid=(B, num_tiles),                 # both axes independent now
            in_specs=in_specs,
            out_specs=pl.BlockSpec((1, Cout, l_tile), lambda b, t: (b, 0, t)),
        ),
        compiler_params=pltpu.CompilerParams(
            dimension_semantics=("parallel", "parallel"),
            vmem_limit_bytes=48 * 1024 * 1024),
        cost_estimate=pl.CostEstimate(
            flops=flops, transcendentals=0, bytes_accessed=bytes_accessed),
    )(*args)

    return out[:, :, :L] if Lp != L else out


def _reference(x_ncw, params, *, kernel_size=3, dilation=1):
    """Pure-JAX reference mirroring the PyTorch ops (NCW, causal conv)."""
    w1, b1, w2, b2, wr, br = params
    P = (kernel_size - 1) * dilation
    L = x_ncw.shape[2]

    def causal_conv_relu(inp, w, b):
        xp = jnp.pad(inp, ((0, 0), (0, 0), (P, 0)))
        out = sum(jnp.einsum("oc,bcl->bol", w[:, :, k],
                             xp[:, :, k * dilation: k * dilation + L])
                  for k in range(kernel_size))
        return jnp.maximum(out + b[None, :, None], 0.0)

    h = causal_conv_relu(x_ncw, w1, b1)
    h = causal_conv_relu(h, w2, b2)
    if wr is not None:
        res = jnp.einsum("oc,bcl->bol", wr[:, :, 0], x_ncw) + br[None, :, None]
    else:
        res = x_ncw
    return jnp.maximum(h + res, 0.0)


if __name__ == "__main__":
    B, Cin, Cout, L = 2, 4, 8, 200
    K, DIL = 3, 2

    key = jax.random.PRNGKey(0)
    k0, k1, k2, k3, k4, k5, k6 = jax.random.split(key, 7)

    x = jax.random.normal(k0, (B, Cin, L), dtype=jnp.float32)

    # deterministic parameter init (uniform, small scale); PyTorch layouts.
    w1 = jax.random.uniform(k1, (Cout, Cin, K), jnp.float32, -0.3, 0.3)
    b1 = jax.random.uniform(k2, (Cout,), jnp.float32, -0.1, 0.1)
    w2 = jax.random.uniform(k3, (Cout, Cout, K), jnp.float32, -0.3, 0.3)
    b2 = jax.random.uniform(k4, (Cout,), jnp.float32, -0.1, 0.1)
    wr = jax.random.uniform(k5, (Cout, Cin, 1), jnp.float32, -0.3, 0.3)  # Cin != Cout
    br = jax.random.uniform(k6, (Cout,), jnp.float32, -0.1, 0.1)
    params = (w1, b1, w2, b2, wr, br)

    ref = _reference(x, params, kernel_size=K, dilation=DIL)

    # Single-tile path (default large tile).
    out = jax.block_until_ready(
        tcnn_block(x, params, kernel_size=K, dilation=DIL, l_tile=512))
    assert out.shape == (B, Cout, L)
    assert jnp.allclose(out, ref, atol=2e-3, rtol=2e-3), "f32 kernel mismatch vs reference"

    # Multi-tile path (exercises the cross-tile causal halo).
    out_mt = jax.block_until_ready(
        tcnn_block(x, params, kernel_size=K, dilation=DIL, l_tile=128))
    assert jnp.allclose(out_mt, ref, atol=2e-3, rtol=2e-3), "multi-tile kernel mismatch vs reference"

    # bf16-matmul variant (bf16 x/weights, f32 accumulation) -> looser tolerance.
    out_bf16 = jax.block_until_ready(
        tcnn_block(x, params, kernel_size=K, dilation=DIL, l_tile=512,
                   use_bf16_matmul=True))
    assert jnp.allclose(out_bf16, ref, atol=1e-1, rtol=1e-1), "bf16 kernel mismatch vs reference"

    print("KERNEL_OK")
</pallas_src>

<mosaic_0001>
module attributes {stable_mosaic.version = 11 : i64} {
  func.func @_tcnn_kernel(%arg0: i32, %arg1: i32, %arg2: memref<1x4x512xf32, #tpu.memory_space<vmem>>, %arg3: memref<1x1x4x128xf32, #tpu.memory_space<vmem>>, %arg4: memref<3x8x4xf32, #tpu.memory_space<vmem>>, %arg5: memref<8x1xf32, #tpu.memory_space<vmem>>, %arg6: memref<3x8x8xf32, #tpu.memory_space<vmem>>, %arg7: memref<8x1xf32, #tpu.memory_space<vmem>>, %arg8: memref<8x4xf32, #tpu.memory_space<vmem>>, %arg9: memref<8x1xf32, #tpu.memory_space<vmem>>, %arg10: memref<1x8x512xf32, #tpu.memory_space<vmem>>) attributes {dimension_semantics = [#tpu.dimension_semantics<parallel>, #tpu.dimension_semantics<parallel>], iteration_bounds = array<i64: 2, 1>, scalar_prefetch = 0 : i64, scratch_operands = 0 : i64, tpu.core_type = #tpu.core_type<tc>, window_params = [{transform_indices = @transform_0, window_bounds = array<i64: 1, 4, 512>}, {transform_indices = @transform_1, window_bounds = array<i64: 1, 1, 4, 128>}, {pipeline_mode = #tpu.pipeline_mode<synchronous>, transform_indices = @transform_2, window_bounds = array<i64: 3, 8, 4>}, {pipeline_mode = #tpu.pipeline_mode<synchronous>, transform_indices = @transform_3, window_bounds = array<i64: 8, 1>}, {pipeline_mode = #tpu.pipeline_mode<synchronous>, transform_indices = @transform_4, window_bounds = array<i64: 3, 8, 8>}, {pipeline_mode = #tpu.pipeline_mode<synchronous>, transform_indices = @transform_5, window_bounds = array<i64: 8, 1>}, {pipeline_mode = #tpu.pipeline_mode<synchronous>, transform_indices = @transform_6, window_bounds = array<i64: 8, 4>}, {pipeline_mode = #tpu.pipeline_mode<synchronous>, transform_indices = @transform_7, window_bounds = array<i64: 8, 1>}, {transform_indices = @transform_8, window_bounds = array<i64: 1, 8, 512>}]} {
    %c0 = arith.constant 0 : index
    %c0_0 = arith.constant 0 : index
    %c0_1 = arith.constant 0 : index
    %0 = vector.load %arg2[%c0, %c0_0, %c0_1] : memref<1x4x512xf32, #tpu.memory_space<vmem>>, vector<1x4x512xf32>
    %1 = vector.shape_cast %0 : vector<1x4x512xf32> to vector<4x512xf32>
    %c0_2 = arith.constant 0 : index
    %c0_3 = arith.constant 0 : index
    %c0_4 = arith.constant 0 : index
    %c0_5 = arith.constant 0 : index
    %2 = vector.load %arg3[%c0_2, %c0_3, %c0_4, %c0_5] : memref<1x1x4x128xf32, #tpu.memory_space<vmem>>, vector<1x1x4x128xf32>
    %3 = vector.shape_cast %2 : vector<1x1x4x128xf32> to vector<4x128xf32>
    %4 = tpu.concatenate %3, %1 in 1 : vector<4x128xf32>, vector<4x512xf32> -> vector<4x640xf32>
    %c0_6 = arith.constant 0 : index
    %c0_7 = arith.constant 0 : index
    %c0_8 = arith.constant 0 : index
    %5 = vector.load %arg4[%c0_6, %c0_7, %c0_8] : memref<3x8x4xf32, #tpu.memory_space<vmem>>, vector<1x8x4xf32>
    %6 = vector.shape_cast %5 : vector<1x8x4xf32> to vector<8x4xf32>
    %7 = vector.extract_strided_slice %4 {offsets = [0, 120], sizes = [4, 516], strides = [1, 1]} : vector<4x640xf32> to vector<4x516xf32>
    %cst = arith.constant dense<0.000000e+00> : vector<8x516xf32>
    %8 = tpu.matmul %6, %7, %cst {dimension_numbers = #tpu.dot_dimension_numbers<[1], [0], [0], [1], [0, 0, 1, 1], [], []>} : vector<8x4xf32>, vector<4x516xf32>, vector<8x516xf32> -> vector<8x516xf32>
    %c1 = arith.constant 1 : index
    %c0_9 = arith.constant 0 : index
    %c0_10 = arith.constant 0 : index
    %9 = vector.load %arg4[%c1, %c0_9, %c0_10] : memref<3x8x4xf32, #tpu.memory_space<vmem>>, vector<1x8x4xf32>
    %10 = vector.shape_cast %9 : vector<1x8x4xf32> to vector<8x4xf32>
    %11 = vector.extract_strided_slice %4 {offsets = [0, 122], sizes = [4, 516], strides = [1, 1]} : vector<4x640xf32> to vector<4x516xf32>
    %cst_11 = arith.constant dense<0.000000e+00> : vector<8x516xf32>
    %12 = tpu.matmul %10, %11, %cst_11 {dimension_numbers = #tpu.dot_dimension_numbers<[1], [0], [0], [1], [0, 0, 1, 1], [], []>} : vector<8x4xf32>, vector<4x516xf32>, vector<8x516xf32> -> vector<8x516xf32>
    %13 = arith.addf %8, %12 : vector<8x516xf32>
    %c2 = arith.constant 2 : index
    %c0_12 = arith.constant 0 : index
    %c0_13 = arith.constant 0 : index
    %14 = vector.load %arg4[%c2, %c0_12, %c0_13] : memref<3x8x4xf32, #tpu.memory_space<vmem>>, vector<1x8x4xf32>
    %15 = vector.shape_cast %14 : vector<1x8x4xf32> to vector<8x4xf32>
    %16 = vector.extract_strided_slice %4 {offsets = [0, 124], sizes = [4, 516], strides = [1, 1]} : vector<4x640xf32> to vector<4x516xf32>
    %cst_14 = arith.constant dense<0.000000e+00> : vector<8x516xf32>
    %17 = tpu.matmul %15, %16, %cst_14 {dimension_numbers = #tpu.dot_dimension_numbers<[1], [0], [0], [1], [0, 0, 1, 1], [], []>} : vector<8x4xf32>, vector<4x516xf32>, vector<8x516xf32> -> vector<8x516xf32>
    %18 = arith.addf %13, %17 : vector<8x516xf32>
    %c0_15 = arith.constant 0 : index
    %c0_16 = arith.constant 0 : index
    %19 = vector.load %arg5[%c0_15, %c0_16] : memref<8x1xf32, #tpu.memory_space<vmem>>, vector<8x1xf32>
    %20 = vector.broadcast %19 : vector<8x1xf32> to vector<8x516xf32>
    %21 = arith.addf %18, %20 : vector<8x516xf32>
    %cst_17 = arith.constant 0.000000e+00 : f32
    %22 = vector.broadcast %cst_17 : f32 to vector<8x516xf32>
    %23 = arith.maximumf %21, %22 : vector<8x516xf32>
    %24 = tpu.iota {dimensions = array<i32: 1>} : vector<8x516xi32>
    %c512_i32 = arith.constant 512 : i32
    %25 = arith.muli %arg1, %c512_i32 : i32
    %c4_i32 = arith.constant 4 : i32
    %26 = arith.subi %c4_i32, %25 : i32
    %27 = vector.broadcast %26 : i32 to vector<8x516xi32>
    %28 = arith.cmpi slt, %24, %27 : vector<8x516xi32>
    %cst_18 = arith.constant 0.000000e+00 : f32
    %29 = vector.broadcast %cst_18 : f32 to vector<8x516xf32>
    %30 = arith.select %28, %29, %23 : vector<8x516xi1>, vector<8x516xf32>
    %c0_19 = arith.constant 0 : index
    %c0_20 = arith.constant 0 : index
    %c0_21 = arith.constant 0 : index
    %31 = vector.load %arg6[%c0_19, %c0_20, %c0_21] : memref<3x8x8xf32, #tpu.memory_space<vmem>>, vector<1x8x8xf32>
    %32 = vector.shape_cast %31 : vector<1x8x8xf32> to vector<8x8xf32>
    %33 = vector.extract_strided_slice %30 {offsets = [0, 0], sizes = [8, 512], strides = [1, 1]} : vector<8x516xf32> to vector<8x512xf32>
    %cst_22 = arith.constant dense<0.000000e+00> : vector<8x512xf32>
    %34 = tpu.matmul %32, %33, %cst_22 {dimension_numbers = #tpu.dot_dimension_numbers<[1], [0], [0], [1], [0, 0, 1, 1], [], []>} : vector<8x8xf32>, vector<8x512xf32>, vector<8x512xf32> -> vector<8x512xf32>
    %c1_23 = arith.constant 1 : index
    %c0_24 = arith.constant 0 : index
    %c0_25 = arith.constant 0 : index
    %35 = vector.load %arg6[%c1_23, %c0_24, %c0_25] : memref<3x8x8xf32, #tpu.memory_space<vmem>>, vector<1x8x8xf32>
    %36 = vector.shape_cast %35 : vector<1x8x8xf32> to vector<8x8xf32>
    %37 = vector.extract_strided_slice %30 {offsets = [0, 2], sizes = [8, 512], strides = [1, 1]} : vector<8x516xf32> to vector<8x512xf32>
    %cst_26 = arith.constant dense<0.000000e+00> : vector<8x512xf32>
    %38 = tpu.matmul %36, %37, %cst_26 {dimension_numbers = #tpu.dot_dimension_numbers<[1], [0], [0], [1], [0, 0, 1, 1], [], []>} : vector<8x8xf32>, vector<8x512xf32>, vector<8x512xf32> -> vector<8x512xf32>
    %39 = arith.addf %34, %38 : vector<8x512xf32>
    %c2_27 = arith.constant 2 : index
    %c0_28 = arith.constant 0 : index
    %c0_29 = arith.constant 0 : index
    %40 = vector.load %arg6[%c2_27, %c0_28, %c0_29] : memref<3x8x8xf32, #tpu.memory_space<vmem>>, vector<1x8x8xf32>
    %41 = vector.shape_cast %40 : vector<1x8x8xf32> to vector<8x8xf32>
    %42 = vector.extract_strided_slice %30 {offsets = [0, 4], sizes = [8, 512], strides = [1, 1]} : vector<8x516xf32> to vector<8x512xf32>
    %cst_30 = arith.constant dense<0.000000e+00> : vector<8x512xf32>
    %43 = tpu.matmul %41, %42, %cst_30 {dimension_numbers = #tpu.dot_dimension_numbers<[1], [0], [0], [1], [0, 0, 1, 1], [], []>} : vector<8x8xf32>, vector<8x512xf32>, vector<8x512xf32> -> vector<8x512xf32>
    %44 = arith.addf %39, %43 : vector<8x512xf32>
    %c0_31 = arith.constant 0 : index
    %c0_32 = arith.constant 0 : index
    %45 = vector.load %arg7[%c0_31, %c0_32] : memref<8x1xf32, #tpu.memory_space<vmem>>, vector<8x1xf32>
    %46 = vector.broadcast %45 : vector<8x1xf32> to vector<8x512xf32>
    %47 = arith.addf %44, %46 : vector<8x512xf32>
    %cst_33 = arith.constant 0.000000e+00 : f32
    %48 = vector.broadcast %cst_33 : f32 to vector<8x512xf32>
    %49 = arith.maximumf %47, %48 : vector<8x512xf32>
    %c0_34 = arith.constant 0 : index
    %c0_35 = arith.constant 0 : index
    %50 = vector.load %arg8[%c0_34, %c0_35] : memref<8x4xf32, #tpu.memory_space<vmem>>, vector<8x4xf32>
    %cst_36 = arith.constant dense<0.000000e+00> : vector<8x512xf32>
    %51 = tpu.matmul %50, %1, %cst_36 {dimension_numbers = #tpu.dot_dimension_numbers<[1], [0], [0], [1], [0, 0, 1, 1], [], []>} : vector<8x4xf32>, vector<4x512xf32>, vector<8x512xf32> -> vector<8x512xf32>
    %c0_37 = arith.constant 0 : index
    %c0_38 = arith.constant 0 : index
    %52 = vector.load %arg9[%c0_37, %c0_38] : memref<8x1xf32, #tpu.memory_space<vmem>>, vector<8x1xf32>
    %53 = vector.broadcast %52 : vector<8x1xf32> to vector<8x512xf32>
    %54 = arith.addf %51, %53 : vector<8x512xf32>
    %55 = arith.addf %49, %54 : vector<8x512xf32>
    %cst_39 = arith.constant 0.000000e+00 : f32
    %56 = vector.broadcast %cst_39 : f32 to vector<8x512xf32>
    %57 = arith.maximumf %55, %56 : vector<8x512xf32>
    %c0_40 = arith.constant 0 : index
    %c0_41 = arith.constant 0 : index
    %c0_42 = arith.constant 0 : index
    %58 = vector.load %arg10[%c0_40, %c0_41, %c0_42] : memref<1x8x512xf32, #tpu.memory_space<vmem>>, vector<1x8x512xf32>
    %59 = vector.shape_cast %58 : vector<1x8x512xf32> to vector<8x512xf32>
    %60 = vector.shape_cast %57 : vector<8x512xf32> to vector<1x8x512xf32>
    tpu.vector_store %arg10[%c0_40, %c0_41, %c0_42], %60 {strides = array<i32>} : memref<1x8x512xf32, #tpu.memory_space<vmem>>, vector<1x8x512xf32>,
    return
  }
  func.func @transform_0(%arg0: i32, %arg1: i32) -> (i32, i32, i32) {
    %c0_i32 = arith.constant 0 : i32
    %c0_i32_0 = arith.constant 0 : i32
    return %arg0, %c0_i32, %arg1 : i32, i32, i32
  }
  func.func @transform_1(%arg0: i32, %arg1: i32) -> (i32, i32, i32, i32) {
    %c0_i32 = arith.constant 0 : i32
    %c0_i32_0 = arith.constant 0 : i32
    %c0_i32_1 = arith.constant 0 : i32
    return %arg0, %arg1, %c0_i32, %c0_i32_0 : i32, i32, i32, i32
  }
  func.func @transform_2(%arg0: i32, %arg1: i32) -> (i32, i32, i32) {
    %c0_i32 = arith.constant 0 : i32
    %c0_i32_0 = arith.constant 0 : i32
    %c0_i32_1 = arith.constant 0 : i32
    %c0_i32_2 = arith.constant 0 : i32
    return %c0_i32, %c0_i32_0, %c0_i32_1 : i32, i32, i32
  }
  func.func @transform_3(%arg0: i32, %arg1: i32) -> (i32, i32) {
    %c0_i32 = arith.constant 0 : i32
    %c0_i32_0 = arith.constant 0 : i32
    %c0_i32_1 = arith.constant 0 : i32
    return %c0_i32, %c0_i32_0 : i32, i32
  }
  func.func @transform_4(%arg0: i32, %arg1: i32) -> (i32, i32, i32) {
    %c0_i32 = arith.constant 0 : i32
    %c0_i32_0 = arith.constant 0 : i32
    %c0_i32_1 = arith.constant 0 : i32
    %c0_i32_2 = arith.constant 0 : i32
    return %c0_i32, %c0_i32_0, %c0_i32_1 : i32, i32, i32
  }
  func.func @transform_5(%arg0: i32, %arg1: i32) -> (i32, i32) {
    %c0_i32 = arith.constant 0 : i32
    %c0_i32_0 = arith.constant 0 : i32
    %c0_i32_1 = arith.constant 0 : i32
    return %c0_i32, %c0_i32_0 : i32, i32
  }
  func.func @transform_6(%arg0: i32, %arg1: i32) -> (i32, i32) {
    %c0_i32 = arith.constant 0 : i32
    %c0_i32_0 = arith.constant 0 : i32
    %c0_i32_1 = arith.constant 0 : i32
    return %c0_i32, %c0_i32_0 : i32, i32
  }
  func.func @transform_7(%arg0: i32, %arg1: i32) -> (i32, i32) {
    %c0_i32 = arith.constant 0 : i32
    %c0_i32_0 = arith.constant 0 : i32
    %c0_i32_1 = arith.constant 0 : i32
    return %c0_i32, %c0_i32_0 : i32, i32
  }
  func.func @transform_8(%arg0: i32, %arg1: i32) -> (i32, i32, i32) {
    %c0_i32 = arith.constant 0 : i32
    %c0_i32_0 = arith.constant 0 : i32
    return %arg0, %c0_i32, %arg1 : i32, i32, i32
  }
}

</mosaic_0001>

<bundles_post_ra>
// kernel: tpu_custom_call.1
= control target key start
LH: loop header
LB: loop body
LE: loop exit
PB: predicated region body
PF: predicated region fallthrough
CT: control target
= control target key end

     0   :  { %13 = vsyncpa [#allocation3], 0  ;;  %s2437_s0 = inlined_call_operand.vmem [shape: f32[2,4,512], index: 0, kind: input, shape index: {}]   ;;  %s2438_s1 = inlined_call_operand.vmem [shape: f32[2,1,4,128], index: 1, kind: input, shape index: {}]   ;;  %s2439_s2 = inlined_call_operand.vmem [shape: f32[3,8,4], index: 2, kind: input, shape index: {}]   ;;  %s2440_s3 = inlined_call_operand.vmem [shape: f32[8,1], index: 3, kind: input, shape index: {}]   ;;  %s2441_s4 = inlined_call_operand.vmem [shape: f32[3,8,8], index: 4, kind: input, shape index: {}]   ;;  %s2442_s5 = inlined_call_operand.vmem [shape: f32[8,1], index: 5, kind: input, shape index: {}]   ;;  %s2443_s6 = inlined_call_operand.vmem [shape: f32[8,4], index: 6, kind: input, shape index: {}]   ;;  %s2444_s7 = inlined_call_operand.vmem [shape: f32[8,1], index: 7, kind: input, shape index: {}]   ;;  %s2445_s8 = inlined_call_operand.hbm [shape: f32[2,8,512], index: 8, kind: output, shape index: {}]  }
   0x1   :  { %15 = vsyncpa [#allocation3 + $0x1], 0  ;;  %s2196_s27 = smov 0   ;;  %s2198_s28 = smov 0  }
   0x2   :  { %s2200_s29 = smov 0   ;;  %s2202_s30 = smov 0  }
   0x3   :  { %s2204_s9 = smov 0   ;;  %s2206_s10 = smov 0  }
   0x4 LB: > { %s1918_s11 = sadd.s32 4294967295, %s2140_s10   ;;  %s1919_s12 = sadd.s32 4294967294, %s2140_s10   ;;  %s2140_s10 = sphi %s2206_s10, %s21_s10   ;;  %s2136_s9 = sphi %s2204_s9, %s2452_s9   ;;  %s2132_s30 = sphi %s2202_s30, %s2451_s30   ;;  %s2128_s29 = sphi %s2200_s29, %s2450_s29   ;;  %s2124_s28 = sphi %s2198_s28, %s2449_s28   ;;  %s2120_s27 = sphi %s2196_s27, %s2448_s27  }
   0x5   : > { %s33_s13 = sadd.s32 1, %s2136_s9  ;;  %s224_s14 = sadd.s32 1, %s2128_s29 }
   0x6   : > { %p35_p0 = scmp.ge.s32.totalorder %s33_s13, 2  ;;  %p234_p1 = scmp.ne.s32.totalorder %s2128_s29, %s2124_s28 }
   0x7   : > { %p235_p2 = scmp.eq.s32.totalorder %s1918_s11, 1  ;;  %p240_p3 = scmp.ne.s32.totalorder %s2124_s28, %s2120_s27 }
   0x8   : > { %s2454_s13 = smov (%p35_p0, %s33_s13), 0  ;;  %p241_p5 = scmp.eq.s32.totalorder %s1919_s12, 1 }
   0x9   : > { %p2236_p4 = por %p235_p2, %p234_p1  ;;  %s219_s16 = ssub.s32 %s2136_s9, %s2454_s13 }
   0xa   : > { %p1922_p6 = scmp.ge.s32.totalorder %s2140_s10, 1  ;;  %p222_p7 = scmp.eq.s32.totalorder %s219_s16, 0 }
   0xb   : > { %p2243_p8 = por %p241_p5, %p240_p3  ;;  %p300_p9 = scmp.lt.s32.totalorder %s2140_s10, 3 }
   0xc   : > { %s2249_s18 = scalar_select %p222_p7, %s2128_s29, %s224_s14  }
   0xd   : > { %p301_p10 = pnand %p1922_p6, %p300_p9 }
   0xe   : > { %p346_p11 = scmp.lt.s32.totalorder (!%p301_p10), %s2132_s30, 1  ;;  %s2143_s12 = smov (!%p301_p10), 6  }
   0xf   : > { %304 = sbr.rel (%p301_p10) target bundleno = 722 (0x2d2), region = 52  ;;  %s2144_s14 = smov (!%p301_p10), 8  }
  0x10   : > { %s2146_s16 = smov (!%p301_p10), 4  }
  0x14   : > { %v2142_v0 = vmov 0.0   ;;  %s347_s19 = scalar_select %p346_p11, %s2132_s30, 1  ;;  %v2145_v6 = vmov 0   ;;  %v1102_v7 = vld [vmem:[%s2440_s3] sm:$0xff]  ;;  %vm384_vm0 = vcmask 48128   ;;  %vm393_vm1 = vcmask 1043456  }
  0x15   : > { %468 = vmatprep.mubr.f32.mxu0 %v2142_v0  ;;  %539 = vmatprep.mubr.f32.mxu1 %v2142_v0  ;;  %v1927_v13 = vld [vmem:[%s2439_s2 + $0x8] sm:$0xff]  ;;  %vm389_vm2 = vcmask 31744   ;;  %vm2147_vm3 = vmmov 0   ;;  %vm626_vm4 = vcmask 64512   ;;  %v370_v23 = vld [vmem:[%s2439_s2] sm:$0xff]  ;;  %v1944_v32 = vld [vmem:[%s2439_s2 + $0x10] sm:$0xff]  ;;  %v1118_v49 = vlaneseq }
  0x16   : > { %s1926_s20 = sshll.u32 %s347_s19, 2  ;;  %s1974_s21 = sshll.u32 %s347_s19, 4  ;;  %2060 = vset.pattern.permute.xlu1 %v2145_v6  ;;  %2061 = vset.pattern.permute.xlu0 %v2145_v6  ;;  %vm1155_vm6 = vcmask 1031168   ;;  %vm1466_vm8 = vcmask 1014784  }
  0x17   : > { %s361_s24 = scalar_lea.vmem %s2438_s1, %s1926_s20  ;;  %s353_s11 = scalar_lea.vmem %s2437_s0, %s1974_s21  ;;  %v1119_v54 = vand.u32 127, %v1118_v49 }
  0x18   : > { %v365_v1 = vld [vmem:[%s361_s24] sm:$0xf]  ;;  %v2268_v4 = vld [vmem:[%s353_s11 + $0x8] sm:$0xff]  ;;  %s1975_s20 = sshll.u32 %s2132_s30, 9  ;;  %s2150_s30 = smov [#allocation2]  }
  0x19   : > { %v2261_v2 = vld [vmem:[%s353_s11] sm:$0xff]  ;;  %374 = vrot.lane.b32.xlu1 %v365_v1, %s2143_s12  ;;  %v2274_v5 = vcombine.high %v2268_v4, %v2268_v4  ;;  %vm1127_vm5 = vcmp.lt.s32.totalorder %v1119_v54, 4  ;;  %s2148_s11 = smov 126   ;;  %s1825_s24 = scalar_lea.hbm %s2445_s8, %s1975_s20 }
  0x1a   : > { %376 = vrot.lane.b32.xlu0 %v2261_v2, %s2143_s12  ;;  %v2266_v3 = vcombine.high %v2261_v2, %v2261_v2  ;;  %vm1956_vm7 = vmneg %vm1127_vm5 }
  0x1d   : > { %380 = vrot.lane.b32.xlu1 %v2268_v4, %s2143_s12 }
  0x1e   : > { %378 = vrot.lane.b32.xlu0 %v2266_v3, %s2143_s12 }
  0x21   : > { %618 = vrot.lane.b32.xlu1 %v2261_v2, %s2144_s14 }
  0x22   : > { %382 = vrot.lane.b32.xlu0 %v2274_v5, %s2143_s12  ;;  %s2149_s12 = smov 124  }
  0x25   : > { %616 = vrot.lane.b32.xlu1 %v365_v1, %s2144_s14 }
  0x26   : > { %620 = vrot.lane.b32.xlu0 %v2266_v3, %s2144_s14 }
  0x29   : > { %624 = vrot.lane.b32.xlu1 %v2274_v5, %s2144_s14 }
  0x2a   : > { %622 = vrot.lane.b32.xlu0 %v2268_v4, %s2144_s14  ;;  %s342_s14 = sand.u32 1, %s2124_s28  }
  0x2b   : > { %s1811_s25 = scalar_lea.sflag [#allocation3], %s342_s14 }
  0x2d   : > { %862 = vrot.lane.b32.xlu1 %v2266_v3, %s2146_s16 }
  0x2e   : > { %860 = vrot.lane.b32.xlu0 %v2261_v2, %s2146_s16 }
  0x31   : > { %864 = vrot.lane.b32.xlu1 %v2268_v4, %s2146_s16 }
  0x32   : > { %858 = vrot.lane.b32.xlu0 %v365_v1, %s2146_s16 }
  0x35   : > { %1105 = vperm.xlu1 %2060, %v1102_v7  }
  0x36   : > { %866 = vrot.lane.b32.xlu0 %v2274_v5, %s2146_s16  ;;  %s1923_s16 = sshll.u32 %s342_s14, 5 }
  0x37   : > { %s344_s19 = scalar_lea.vmem [#allocation2], %s1923_s16 }
  0x38   : > { %s1827_s21 = sshll.u32 %s344_s19, 4  ;;  %s1828_s21 = int_to_ptr.vmem [resolvable:$true] %s1827_s21 }
  0x39   : > { %s2064_s26 = scalar_lea.vmem %s1828_s21, 512 }
  0x3a   : > { %p2065_p12 = scmp.ne.s32.totalorder %s1828_s21, %s2064_s26 }
  0x3c   : > { %p2066_p13 = pnand %p2065_p12, %p2236_p4 }
  0x3e   : > { %p2067_p0 = pneg %p2066_p13 }
  0x8b   : > { %v375_v8 = vpop.permute.xlu1 %374 }
  0x8c   : > { %v377_v9 = vpop.permute.xlu0 %376 }
  0x8d   : > { %v385_v14 = vsel %vm384_vm0, %v375_v8, %v377_v9 }
  0x8f   : > { %v381_v10 = vpop.permute.xlu1 %380 }
  0x90   : > { %v379_v11 = vpop.permute.xlu0 %378 }
  0x91   : > { %v386_v12 = vsel %vm384_vm0, %v377_v9, %v379_v11  ;;  %v387_v18 = vsel %vm384_vm0, %v379_v11, %v381_v10 }
  0x92   : > { %1928 = vmatprep.subr.msk.mxu0 %vm393_vm1, %v386_v12 }
  0x93   : > { %1929 = vmatpush1.msk.msra.mxu0 %vm393_vm1, %v385_v14  ;;  %v619_v15 = vpop.permute.xlu1 %618 }
  0x94   : > { %1982 = vmatprep.subr.mxu0 %v2142_v0  ;;  %v383_v16 = vpop.permute.xlu0 %382  ;;  %1930 = vmatmul.mubr.msk.f32.vlgmr.msra.gmra.mxu0 %vm389_vm2, %v1927_v13 }
  0x95   : > { %1983 = vmatpush3.msk.msra.mxu0 %vm393_vm1, %v383_v16  ;;  %v388_v17 = vsel %vm384_vm0, %v381_v10, %v383_v16  ;;  %1984 = vmatprep.mubr.msk.f32.mxu0 %vm2147_vm3, %v2142_v0 }
  0x96   : > { %1931 = vmatprep.subr.msk.mxu1 %vm393_vm1, %v388_v17 }
  0x97   : > { %1932 = vmatpush1.msk.msra.mxu1 %vm393_vm1, %v387_v18  ;;  %v617_v19 = vpop.permute.xlu1 %616 }
  0x98   : > { %1933 = vmatmul.mubr.msk.f32.vlgmr.msra.gmra.mxu1 %vm389_vm2, %v1927_v13  ;;  %v621_v20 = vpop.permute.xlu0 %620  ;;  %1985 = vmatmul.mubr.msk.f32.vlgmr.msra.gmra.mxu0 %vm389_vm2, %v1927_v13  ;;  %v627_v21 = vsel %vm626_vm4, %v617_v19, %v619_v15 }
  0x99   : > { %v628_v22 = vsel %vm626_vm4, %v619_v15, %v621_v20  ;;  %708 = vmatprep.mubr.f32.mxu1 %v2142_v0  ;;  %779 = vmatprep.mubr.f32.mxu0 %v2142_v0 }
  0x9a   : > { %1936 = vmatprep.subr.msk.mxu1 %vm393_vm1, %v628_v22  ;;  %v1639_v22 = vld [vmem:[%s2444_s7] sm:$0xff] }
  0x9b   : > { %1937 = vmatpush1.msk.msra.mxu1 %vm393_vm1, %v627_v21  ;;  %v625_v24 = vpop.permute.xlu1 %624  ;;  %v1624_v21 = vld [vmem:[%s2442_s5] sm:$0xff] }
  0x9c   : > { %1938 = vmatmul.mubr.msk.f32.vlgmr.msra.gmra.mxu1 %vm389_vm2, %v370_v23  ;;  %v623_v25 = vpop.permute.xlu0 %622  ;;  %1987 = vmatprep.subr.mxu1 %v2142_v0 }
  0x9d   : > { %v629_v26 = vsel %vm626_vm4, %v621_v20, %v623_v25  ;;  %v630_v27 = vsel %vm626_vm4, %v623_v25, %v625_v24  ;;  %1988 = vmatpush3.msk.msra.mxu1 %vm393_vm1, %v625_v24  ;;  %1989 = vmatprep.mubr.msk.f32.mxu1 %vm2147_vm3, %v2142_v0 }
  0x9e   : > { %1939 = vmatprep.subr.msk.mxu0 %vm393_vm1, %v630_v27 }
  0x9f   : > { %1940 = vmatpush1.msk.msra.mxu0 %vm393_vm1, %v629_v26  ;;  %v863_v28 = vpop.permute.xlu1 %862 }
  0xa0   : > { %1941 = vmatmul.mubr.msk.f32.vlgmr.msra.gmra.mxu0 %vm389_vm2, %v370_v23  ;;  %v861_v29 = vpop.permute.xlu0 %860  ;;  %1990 = vmatmul.mubr.msk.f32.vlgmr.msra.gmra.mxu1 %vm389_vm2, %v370_v23 }
  0xa1   : > { %v869_v30 = vsel %vm389_vm2, %v861_v29, %v863_v28  ;;  %949 = vmatprep.mubr.f32.mxu0 %v2142_v0  ;;  %1020 = vmatprep.mubr.f32.mxu1 %v2142_v0 }
  0xa2   : > { %1945 = vmatprep.subr.msk.mxu0 %vm393_vm1, %v869_v30 }
  0xa3   : > { %v865_v34 = vpop.permute.xlu1 %864 }
  0xa4   : > { %v859_v31 = vpop.permute.xlu0 %858  ;;  %v870_v37 = vsel %vm389_vm2, %v863_v28, %v865_v34  ;;  %v1953_v28 = vld [vmem:[%s2441_s4 + $0x8] sm:$0xff] }
  0xa5   : > { %v868_v33 = vsel %vm389_vm2, %v859_v31, %v861_v29 }
  0xa6   : > { %1946 = vmatpush1.msk.msra.mxu0 %vm393_vm1, %v868_v33  ;;  %v1137_v33 = vld [vmem:[%s2441_s4] sm:$0xff] }
  0xa7   : > { %1947 = vmatmul.mubr.msk.f32.vlgmr.msra.gmra.mxu0 %vm389_vm2, %v1944_v32  ;;  %1992 = vmatprep.subr.mxu0 %v2142_v0 }
  0xa8   : > { %v867_v35 = vpop.permute.xlu0 %866  ;;  %1994 = vmatprep.mubr.msk.f32.mxu0 %vm2147_vm3, %v2142_v0 }
  0xa9   : > { %v871_v36 = vsel %vm389_vm2, %v865_v34, %v867_v35  ;;  %1993 = vmatpush3.msk.msra.mxu0 %vm393_vm1, %v867_v35 }
  0xaa   : > { %1948 = vmatprep.subr.msk.mxu1 %vm393_vm1, %v871_v36 }
  0xab   : > { %1949 = vmatpush1.msk.msra.mxu1 %vm393_vm1, %v870_v37  ;;  %1995 = vmatmul.mubr.msk.f32.vlgmr.msra.gmra.mxu0 %vm389_vm2, %v1944_v32 }
  0xac   : > { %1950 = vmatmul.mubr.msk.f32.vlgmr.msra.gmra.mxu1 %vm389_vm2, %v1944_v32  ;;  %1302 = vmatprep.mubr.f32.mxu0 %v2142_v0 }
  0xad   : > { %1231 = vmatprep.mubr.f32.mxu1 %v2142_v0 }
  0xb0   : > { %v1106_v53 = vpop.permute.xlu1 %1105 }
 0x154   : > { %v470_v38 = vpop.f32.mrf.mxu0 }
 0x156   : > { %v472_v39 = vpop.f32.mrf.mxu0 }
 0x158   : > { %v541_v40 = vpop.f32.mrf.mxu1  ;;  %v612_v41 = vpop.f32.mrf.mxu0 }
 0x15a   : > { %v543_v42 = vpop.f32.mrf.mxu1  ;;  %v1986_v43 = vpop.f32.mrf.mxu0 }
 0x15c   : > { %v710_v44 = vpop.f32.mrf.mxu1 }
 0x15d   : > { %v711_v51 = vadd.f32 %v710_v44, %v470_v38  ;;  %v1638_v44 = vld [vmem:[%s2443_s6] sm:$0xff] }
 0x15e   : > { %v712_v45 = vpop.f32.mrf.mxu1 }
 0x15f   : > { %v713_v55 = vadd.f32 %v712_v45, %v472_v39 }
 0x160   : > { %v852_v46 = vpop.f32.mrf.mxu1  ;;  %v781_v47 = vpop.f32.mrf.mxu0 }
 0x161   : > { %v782_v60 = vadd.f32 %v781_v47, %v541_v40  ;;  %v853_v61 = vadd.f32 %v852_v46, %v612_v41  ;;  %v1960_v41 = vld [vmem:[%s2441_s4 + $0x10] sm:$0xff] }
 0x162   : > { %v1991_v48 = vpop.f32.mrf.mxu1  ;;  %v783_v50 = vpop.f32.mrf.mxu0 }
 0x163   : > { %v784_v6 = vadd.f32 %v783_v50, %v543_v42 }
 0x167   : > { %v951_v52 = vpop.f32.mrf.mxu0 }
 0x168   : > { %v1097_v56 = vadd.f32 %v951_v52, %v711_v51 }
 0x169   : > { %v953_v57 = vpop.f32.mrf.mxu0 }
 0x16a   : > { %v1098_v58 = vadd.f32 %v953_v57, %v713_v55  ;;  %v1108_v59 = vadd.f32 %v1106_v53, %v1097_v56 }
 0x16b   : > { %v1093_v62 = vpop.f32.mrf.mxu0 }
 0x16c   : > { %v1022_v63 = vpop.f32.mrf.mxu1  ;;  %v1113_v1 = vmax.f32 %v1108_v59, 0.0  ;;  %v1109_v7 = vadd.f32 %v1106_v53, %v1098_v58  ;;  %v1101_v8 = vadd.f32 %v1093_v62, %v853_v61 }
 0x16d   : > { %v1099_v9 = vadd.f32 %v1022_v63, %v782_v60  ;;  %v1996_v10 = vpop.f32.mrf.mxu0 }
 0x16e   : > { %v1024_v11 = vpop.f32.mrf.mxu1  ;;  %v1132_v12 = vsel %vm1127_vm5, 0.0, %v1113_v1  ;;  %v1114_v15 = vmax.f32 %v1109_v7, 0.0  ;;  %v1112_v16 = vadd.f32 %v1106_v53, %v1101_v8 }
 0x16f   : > { %v1110_v13 = vadd.f32 %v1106_v53, %v1099_v9  ;;  %v1100_v14 = vadd.f32 %v1024_v11, %v784_v6  ;;  %1145 = vrot.lane.b32.xlu0 %v1132_v12, %s2148_s11 }
 0x170   : > { %v1117_v19 = vmax.f32 %v1112_v16, 0.0 }
 0x171   : > { %v1115_v17 = vmax.f32 %v1110_v13, 0.0  ;;  %v1111_v18 = vadd.f32 %v1106_v53, %v1100_v14 }
 0x173   : > { %1147 = vrot.lane.b32.xlu0 %v1114_v15, %s2148_s11  ;;  %1149 = vrot.lane.b32.xlu1 %v1115_v17, %s2148_s11  ;;  %v1116_v20 = vmax.f32 %v1111_v18, 0.0 }
 0x177   : > { %1153 = vrot.lane.b32.xlu1 %v1117_v19, %s2148_s11  ;;  %1151 = vrot.lane.b32.xlu0 %v1116_v20, %s2148_s11  ;;  %s2068_s11 = sshll.u32 %s2150_s30, 4  ;;  %s2069_s11 = int_to_ptr.vmem [resolvable:$false] %s2068_s11 }
 0x178   : > { %p2071_p1 = scmp.lt.s32.totalorder %s1828_s21, %s2069_s11 }
 0x17b   : > { %1458 = vrot.lane.b32.xlu1 %v1114_v15, %s2149_s12  ;;  %1460 = vrot.lane.b32.xlu0 %v1115_v17, %s2149_s12 }
 0x17f   : > { %1462 = vrot.lane.b32.xlu1 %v1116_v20, %s2149_s12  ;;  %1464 = vrot.lane.b32.xlu0 %v1117_v19, %s2149_s12 }
 0x183   : > { %1456 = vrot.lane.b32.xlu1 %v1132_v12, %s2149_s12  ;;  %1627 = vperm.xlu0 %2061, %v1624_v21   ;;  %s2070_s12 = scalar_lea.vmem %s2069_s11, 1024 }
 0x184   : > { %p2072_p2 = scmp.lt.s32.totalorder %s2070_s12, %s2064_s26 }
 0x186   : > { %p2073_p3 = por %p2072_p2, %p2071_p1 }
 0x187   : > { %1642 = vperm.xlu1 %2060, %v1639_v22  }
 0x188   : > { %p2074_p5 = pnand %p2073_p3, %p2067_p0 }
 0x1e1   : > { %v1146_v23 = vpop.permute.xlu0 %1145 }
 0x1e5   : > { %v1150_v24 = vpop.permute.xlu1 %1149  ;;  %v1148_v25 = vpop.permute.xlu0 %1147 }
 0x1e6   : > { %v1156_v26 = vsel %vm1155_vm6, %v1146_v23, %v1148_v25  ;;  %v1157_v27 = vsel %vm1155_vm6, %v1148_v25, %v1150_v24 }
 0x1e7   : > { %1197 = vmatprep.subr.mxu1 %v1157_v27 }
 0x1e8   : > { %1198 = vmatpush1.msra.mxu1 %v1156_v26 }
 0x1e9   : > { %v1154_v29 = vpop.permute.xlu1 %1153  ;;  %1342 = vmatprep.subr.mxu1 %v1114_v15  ;;  %v1152_v30 = vpop.permute.xlu0 %1151  ;;  %1954 = vmatmul.mubr.msk.f32.vlgmr.msra.gmra.mxu1 %vm626_vm4, %v1953_v28 }
 0x1ea   : > { %v1158_v31 = vsel %vm1155_vm6, %v1150_v24, %v1152_v30  ;;  %1957 = vmatpush1.msk.msra.mxu1 %vm1956_vm7, %v1113_v1  ;;  %v1159_v32 = vsel %vm1155_vm6, %v1152_v30, %v1154_v29  ;;  %1376 = vmatprep.mubr.f32.mxu1 %v2142_v0 }
 0x1eb   : > { %1268 = vmatprep.subr.mxu0 %v1159_v32 }
 0x1ec   : > { %1269 = vmatpush1.msra.mxu0 %v1158_v31 }
 0x1ed   : > { %v1459_v34 = vpop.permute.xlu1 %1458  ;;  %1955 = vmatmul.mubr.msk.f32.vlgmr.msra.gmra.mxu0 %vm626_vm4, %v1953_v28  ;;  %1413 = vmatprep.subr.mxu0 %v1116_v20  ;;  %v1461_v35 = vpop.permute.xlu0 %1460 }
 0x1ee   : > { %1414 = vmatpush1.msra.mxu0 %v1115_v17  ;;  %v1468_v36 = vsel %vm1466_vm8, %v1459_v34, %v1461_v35  ;;  %1447 = vmatprep.mubr.f32.mxu0 %v2142_v0 }
 0x1ef   : > { %1508 = vmatprep.subr.mxu1 %v1468_v36  ;;  %1958 = vmatmul.mubr.msk.f32.vlgmr.msra.gmra.mxu1 %vm626_vm4, %v1137_v33 }
 0x1f0   : > { %1542 = vmatprep.mubr.f32.mxu1 %v2142_v0 }
 0x1f1   : > { %v1463_v37 = vpop.permute.xlu1 %1462  ;;  %1959 = vmatmul.mubr.msk.f32.vlgmr.msra.gmra.mxu0 %vm626_vm4, %v1137_v33  ;;  %v1465_v38 = vpop.permute.xlu0 %1464 }
 0x1f2   : > { %v1469_v39 = vsel %vm1466_vm8, %v1461_v35, %v1463_v37  ;;  %v1470_v40 = vsel %vm1466_vm8, %v1463_v37, %v1465_v38  ;;  %1613 = vmatprep.mubr.f32.mxu0 %v2142_v0 }
 0x1f3   : > { %1579 = vmatprep.subr.mxu0 %v1470_v40 }
 0x1f4   : > { %1580 = vmatpush1.msra.mxu0 %v1469_v39 }
 0x1f5   : > { %v1457_v42 = vpop.permute.xlu1 %1456  ;;  %1962 = vmatmul.mubr.msk.f32.vlgmr.msra.gmra.mxu0 %vm626_vm4, %v1960_v41  ;;  %1966 = vmatprep.subr.msk.mxu0 %vm393_vm1, %v2274_v5 }
 0x1f6   : > { %v1467_v43 = vsel %vm1466_vm8, %v1457_v42, %v1459_v34  ;;  %1967 = vmatpush1.msk.msra.mxu0 %vm393_vm1, %v2268_v4  ;;  %1791 = vmatprep.mubr.f32.mxu0 %v2142_v0 }
 0x1f7   : > { %1509 = vmatpush1.msra.mxu1 %v1467_v43 }
 0x1f8   : > { %1961 = vmatmul.mubr.msk.f32.vlgmr.msra.gmra.mxu1 %vm626_vm4, %v1960_v41  ;;  %1963 = vmatprep.subr.msk.mxu1 %vm393_vm1, %v2266_v3 }
 0x1f9   : > { %1968 = vmatmul.mubr.msk.f32.vlgmr.msra.gmra.mxu0 %vm389_vm2, %v1638_v44  ;;  %1964 = vmatpush1.msk.msra.mxu1 %vm393_vm1, %v2261_v2 }
 0x1fa   : > { %1720 = vmatprep.mubr.f32.mxu1 %v2142_v0 }
 0x1fc   : > { %1965 = vmatmul.mubr.msk.f32.vlgmr.msra.gmra.mxu1 %vm389_vm2, %v1638_v44 }
 0x1fe   : > { %v1628_v3 = vpop.permute.xlu0 %1627 }
 0x202   : > { %v1643_v58 = vpop.permute.xlu1 %1642 }
 0x2a9   : > { %v1233_v4 = vpop.f32.mrf.mxu1 }
 0x2ab   : > { %v1235_v45 = vpop.f32.mrf.mxu1 }
 0x2ad   : > { %v1304_v5 = vpop.f32.mrf.mxu0 }
 0x2af   : > { %v1306_v46 = vpop.f32.mrf.mxu0  ;;  %v1378_v48 = vpop.f32.mrf.mxu1 }
 0x2b0   : > { %v1379_v2 = vadd.f32 %v1378_v48, %v1233_v4 }
 0x2b1   : > { %v1449_v47 = vpop.f32.mrf.mxu0  ;;  %v1380_v52 = vpop.f32.mrf.mxu1 }
 0x2b2   : > { %v1450_v50 = vadd.f32 %v1449_v47, %v1304_v5  ;;  %v1381_v59 = vadd.f32 %v1380_v52, %v1235_v45 }
 0x2b3   : > { %v1451_v49 = vpop.f32.mrf.mxu0 }
 0x2b4   : > { %v1452_v53 = vadd.f32 %v1451_v49, %v1306_v46 }
 0x2b5   : > { %v1615_v51 = vpop.f32.mrf.mxu0 }
 0x2b6   : > { %v1622_v54 = vadd.f32 %v1615_v51, %v1450_v50 }
 0x2b7   : > { %v1617_v55 = vpop.f32.mrf.mxu0 }
 0x2b8   : > { %v1623_v0 = vadd.f32 %v1617_v55, %v1452_v53  ;;  %v1632_v56 = vadd.f32 %v1628_v3, %v1622_v54  ;;  %v1544_v57 = vpop.f32.mrf.mxu1 }
 0x2b9   : > { %v1620_v60 = vadd.f32 %v1544_v57, %v1379_v2  ;;  %v1793_v61 = vpop.f32.mrf.mxu0 }
 0x2ba   : > { %v1633_v62 = vadd.f32 %v1628_v3, %v1623_v0  ;;  %v1636_v63 = vmax.f32 %v1632_v56, 0.0  ;;  %v1794_v1 = vadd.f32 %v1793_v61, %v1643_v58  ;;  %v1546_v6 = vpop.f32.mrf.mxu1 }
 0x2bb   : > { %v1630_v7 = vadd.f32 %v1628_v3, %v1620_v60  ;;  %v1621_v8 = vadd.f32 %v1546_v6, %v1381_v59  ;;  %v1795_v9 = vpop.f32.mrf.mxu0 }
 0x2bc   : > { %v1637_v10 = vmax.f32 %v1633_v62, 0.0  ;;  %v1800_v11 = vadd.f32 %v1794_v1, %v1636_v63  ;;  %v1796_v12 = vadd.f32 %v1795_v9, %v1643_v58  ;;  %v1722_v13 = vpop.f32.mrf.mxu1 }
 0x2bd   : > { %v1634_v14 = vmax.f32 %v1630_v7, 0.0  ;;  %v1631_v15 = vadd.f32 %v1628_v3, %v1621_v8  ;;  %v1723_v16 = vadd.f32 %v1722_v13, %v1643_v58 }
 0x2be   : > { %v1804_v17 = vmax.f32 %v1800_v11, 0.0  ;;  %v1801_v18 = vadd.f32 %v1796_v12, %v1637_v10  ;;  %v1724_v19 = vpop.f32.mrf.mxu1 }
 0x2bf   : > { %v1635_v20 = vmax.f32 %v1631_v15, 0.0  ;;  %v1798_v21 = vadd.f32 %v1723_v16, %v1634_v14  ;;  %v1725_v22 = vadd.f32 %v1724_v19, %v1643_v58 }
 0x2c0   : > { %1808 = vst [vmem:[%s344_s19 + $0x10] sm:$0xff] %v1804_v17  ;;  %v1805_v23 = vmax.f32 %v1801_v18, 0.0 }
 0x2c1   : > { %v1802_v24 = vmax.f32 %v1798_v21, 0.0  ;;  %v1799_v25 = vadd.f32 %v1725_v22, %v1635_v20 }
 0x2c2   : > { %1809 = vst [vmem:[%s344_s19 + $0x18] sm:$0xff] %v1805_v23 }
 0x2c3   : > { %1806 = vst [vmem:[%s344_s19] sm:$0xff] %v1802_v24  ;;  %v1803_v26 = vmax.f32 %v1799_v25, 0.0 }
 0x2c5   : > { %1807 = vst [vmem:[%s344_s19 + $0x8] sm:$0xff] %v1803_v26 }
 0x2c6   : > { %2077 = shalt.err (!%p2074_p5)
}
 0x2c7   : > { %s2078_s16 = scalar_lea.hbm %s1825_s24, 512  ;;  %s2082_s20 = scalar_lea.hbm %s2445_s8, 1024 }
 0x2c8   : > { %p2079_p6 = scmp.ne.s32.totalorder %s1825_s24, %s2078_s16  ;;  %p2083_p10 = scmp.lt.s32.totalorder %s1825_s24, %s2445_s8 }
 0x2c9   : > { %p2084_p11 = scmp.lt.s32.totalorder %s2082_s20, %s2078_s16 }
 0x2ca   : > { %p2080_p7 = pnand %p2079_p6, %p2236_p4 }
 0x2cb   : > { %p2085_p12 = por %p2084_p11, %p2083_p10 }
 0x2cc   : > { %p2081_p9 = pneg %p2080_p7 }
 0x2ce   : > { %p2086_p13 = pnand %p2085_p12, %p2081_p9 }
 0x2d0   : > { %2089 = shalt.err (!%p2086_p13)
}
 0x2d1   : > { %1997 = dma.vmem_to_hbm [thread:$0]  (%p2236_p4), %s1828_s21, 512, %s1825_s24, %s1811_s25  }
 0x2d2 PF: > { %p2003_p0 = scmp.ge.s32.totalorder %s2140_s10, 2  ;;  %s1839_s26 = sand.u32 1, %s2120_s27  }
 0x2d3   : > { %s1840_s30 = scalar_lea.sflag [#allocation3], %s1839_s26 }
 0x2d4   : > { %p2000_p1 = pnand %p2003_p0, %p2243_p8 }
 0x2d6   : > { %p2001_p2 = pneg %p2000_p1 }
 0x2d8   : > { %2115 = dma.done.wait (%p2001_p2), %s1840_s30, 512  }
 0x2d9   : > { %2117 = vsyncadd (%p2001_p2), %s1840_s30, 4294966784  ;;  %s21_s10 = sadd.s32 1, %s2140_s10   ;;  %s2448_s27 = smov %s2124_s28 }
 0x2da   : > { %p18_p3 = scmp.ge.s32.totalorder %s21_s10, 4   ;;  %s2449_s28 = smov %s2128_s29 }
 0x2db   : > { %s2450_s29 = smov %s2249_s18  ;;  %s2451_s30 = smov %s2136_s9 }
 0x2dc   : > { %s2452_s9 = smov %s2454_s13  ;;  %20 = sbr.rel (!%p18_p3) target bundleno = 4 (0x4), region = 94 }
 0x2e1   :  { %1845 = vsyncpa [#allocation3], 1 }
 0x2e2   :  { %1847 = vsyncpa [#allocation3 + $0x1], 1 }

</bundles_post_ra>
